<compile_context>
chip_gen: v5e
topology: v5e:2x2
jax: 0.10.0
libtpu: 0.0.40
codegen_flags: <defaults>
</compile_context>

<pallas_src>
import math
import functools

import jax
import jax.numpy as jnp
from jax.experimental import pallas as pl
from jax.experimental.pallas import tpu as pltpu


def _compiler_params(dimension_semantics, vmem_limit_bytes):
    if vmem_limit_bytes is None:
        return pltpu.CompilerParams(dimension_semantics=dimension_semantics)
    return pltpu.CompilerParams(dimension_semantics=dimension_semantics,
                                vmem_limit_bytes=vmem_limit_bytes)


# --------------------------------------------------------------------------
# Stage 1: LayerNorm + Q/K/V projections, computed once per row block.
# --------------------------------------------------------------------------
def _ln_qkv_kernel(x_ref, g_ref, b_ref, wq_ref, wk_ref, wv_ref,
                   q_ref, k_ref, v_ref, *, h, d_k, eps):
    D = h * d_k
    dt = x_ref.dtype

    xf = x_ref[0].astype(jnp.float32)                       # (TR, D)
    mu = jnp.mean(xf, axis=-1, keepdims=True)
    diff = xf - mu
    # PyTorch x.std(dim=-1): unbiased (N-1) divisor; module divides by (std + eps).
    var = jnp.sum(diff * diff, axis=-1, keepdims=True) * (1.0 / (D - 1))
    inv = 1.0 / (jnp.sqrt(var) + eps)
    n = (diff * inv * g_ref[...].astype(jnp.float32)
         + b_ref[...].astype(jnp.float32)).astype(dt)       # (TR, D) activation dtype

    # Full-width (TR, D) x (D, D) projections; f32 accumulation on the MXU only.
    # 1/sqrt(d_k) is already folded into wq_ref by the wrapper.
    q = jnp.dot(n, wq_ref[...], preferred_element_type=jnp.float32)
    k = jnp.dot(n, wk_ref[...], preferred_element_type=jnp.float32)
    v = jnp.dot(n, wv_ref[...], preferred_element_type=jnp.float32)

    # Head split at store time (static lane slices -> (TR, d_k) stores).
    # Layout plumbing only, not per-head matmuls.
    for i in range(h):
        sl = slice(i * d_k, (i + 1) * d_k)
        q_ref[0, i] = q[:, sl].astype(q_ref.dtype)
        k_ref[0, i] = k[:, sl].astype(k_ref.dtype)
        v_ref[0, i] = v[:, sl].astype(v_ref.dtype)


# --------------------------------------------------------------------------
# Stage 2: flash-style attention over kv blocks + fused out-proj + residual.
# --------------------------------------------------------------------------
def _flash_res_kernel(x_ref, q_ref, k_ref, v_ref, wo_ref, o_ref,
                      m_sc, l_sc, acc_sc, *, h, d_k):
    ki = pl.program_id(2)

    @pl.when(ki == 0)
    def _init():
        m_sc[...] = jnp.full(m_sc.shape, -jnp.inf, jnp.float32)
        l_sc[...] = jnp.zeros(l_sc.shape, jnp.float32)
        acc_sc[...] = jnp.zeros(acc_sc.shape, jnp.float32)

    q = q_ref[0]                                           # (h, TQ,  d_k) dt, pre-scaled
    k = k_ref[0]                                           # (h, TKV, d_k) dt
    v = v_ref[0]                                           # (h, TKV, d_k) dt

    s = jnp.einsum('hqe,hke->hqk', q, k,
                   preferred_element_type=jnp.float32)     # (h, TQ, TKV) f32
    # TODO(synk): no attention-mask path (intentional omission, matches reference).
    m_prev = m_sc[...]
    m_new = jnp.maximum(m_prev, jnp.max(s, axis=-1, keepdims=True))
    alpha = jnp.exp(m_prev - m_new)
    p = jnp.exp(s - m_new)
    l_sc[...] = alpha * l_sc[...] + jnp.sum(p, axis=-1, keepdims=True)
    acc_sc[...] = alpha * acc_sc[...] + jnp.einsum(
        'hqk,hke->hqe', p.astype(v.dtype), v,
        preferred_element_type=jnp.float32)                # (h, TQ, d_k) f32 running ctx
    m_sc[...] = m_new

    @pl.when(ki == pl.num_programs(2) - 1)
    def _finalize():
        dt = q_ref.dtype
        ctx = (acc_sc[...] * pl.reciprocal(l_sc[...], approx=True)).astype(dt)  # (h,TQ,d_k)
        # Fused head reduction: concat heads into one lane-dense (TQ, D) tile and do a
        # single full-depth (TQ, D) x (D, D) matmul against W_o^T.
        ctx_flat = jnp.concatenate([ctx[i] for i in range(h)], axis=-1)          # (TQ, D)
        y = jnp.dot(ctx_flat, wo_ref[...], preferred_element_type=jnp.float32)   # (TQ, D)
        # TODO(synk): training-mode dropout (pltpu.prng_*) not implemented; identity (eval).
        o_ref[0] = (x_ref[0].astype(jnp.float32) + y).astype(o_ref.dtype)


def residual_mha_forward(x, alpha, bias, wq, wk, wv, wo, h, *, eps=1e-6,
                         q_block=None, kv_block=None, row_block=None,
                         vmem_limit_bytes=None):
    """out = x + MHA(LN(x), LN(x), LN(x)).  Weights are PyTorch (out, in) layout."""
    B, S, D = x.shape
    assert D % h == 0
    d_k = D // h
    dt = x.dtype

    def _pick(blk, cap):
        if blk is None:
            blk = S if S <= cap else cap
        assert S % blk == 0
        return blk

    # Tile defaults: sweep 256-512 on v6e; keep 128 on v5e; <=256 + raised
    # vmem_limit_bytes on v7x (64 MiB physical VMEM).
    row_block = _pick(row_block, 256)
    q_block = _pick(q_block, 256)
    kv_block = _pick(kv_block, 512)

    # Wrapper-side glue done once: transposed weights, scale folded into W_q.
    scale = 1.0 / math.sqrt(d_k)
    wq_t = (wq.T * scale).astype(dt)        # (D, D)
    wk_t = wk.T.astype(dt)
    wv_t = wv.T.astype(dt)
    wo_t = wo.T.astype(dt)                  # flat (D, D): fused head contraction
    g2 = alpha.reshape(1, D)
    b2 = bias.reshape(1, D)

    # ---- Stage 1: LN + QKV projection (once per row), outputs head-major Q/K/V ----
    qkv_shape = jax.ShapeDtypeStruct((B, h, S, d_k), dt)
    head_spec = pl.BlockSpec((1, h, row_block, d_k), lambda b, r: (b, 0, r, 0))
    wmat_spec = pl.BlockSpec((D, D), lambda b, r: (0, 0))
    q_hd, k_hd, v_hd = pl.pallas_call(
        functools.partial(_ln_qkv_kernel, h=h, d_k=d_k, eps=eps),
        out_shape=(qkv_shape, qkv_shape, qkv_shape),
        grid=(B, S // row_block),
        in_specs=[
            pl.BlockSpec((1, row_block, D), lambda b, r: (b, r, 0)),
            pl.BlockSpec((1, D), lambda b, r: (0, 0)),
            pl.BlockSpec((1, D), lambda b, r: (0, 0)),
            wmat_spec, wmat_spec, wmat_spec,
        ],
        out_specs=(head_spec, head_spec, head_spec),
        compiler_params=_compiler_params(("parallel", "parallel"), vmem_limit_bytes),
    )(x, g2, b2, wq_t, wk_t, wv_t)

    # ---- Stage 2: flash attention + out-proj + residual ----
    n_qb = S // q_block
    n_kvb = S // kv_block
    qb_spec = pl.BlockSpec((1, h, q_block, d_k), lambda b, qi, ki: (b, 0, qi, 0))
    kvb_spec = pl.BlockSpec((1, h, kv_block, d_k), lambda b, qi, ki: (b, 0, ki, 0))
    out = pl.pallas_call(
        functools.partial(_flash_res_kernel, h=h, d_k=d_k),
        out_shape=jax.ShapeDtypeStruct((B, S, D), dt),
        grid=(B, n_qb, n_kvb),
        in_specs=[
            pl.BlockSpec((1, q_block, D), lambda b, qi, ki: (b, qi, 0)),   # residual rows
            qb_spec, kvb_spec, kvb_spec,
            pl.BlockSpec((D, D), lambda b, qi, ki: (0, 0)),                # W_o^T
        ],
        out_specs=pl.BlockSpec((1, q_block, D), lambda b, qi, ki: (b, qi, 0)),
        scratch_shapes=[
            pltpu.VMEM((h, q_block, 1), jnp.float32),    # running max  m
            pltpu.VMEM((h, q_block, 1), jnp.float32),    # running sum  l
            pltpu.VMEM((h, q_block, d_k), jnp.float32),  # running ctx  acc
        ],
        compiler_params=_compiler_params(("parallel", "parallel", "arbitrary"),
                                         vmem_limit_bytes),
    )(x, q_hd, k_hd, v_hd, wo_t)
    return out


def residual_mha_reference(x, alpha, bias, wq, wk, wv, wo, h, eps=1e-6):
    B, S, D = x.shape
    d_k = D // h
    mu = jnp.mean(x, axis=-1, keepdims=True)
    std = jnp.std(x, axis=-1, keepdims=True, ddof=1)
    n = alpha * (x - mu) / (std + eps) + bias
    Q = (n @ wq.T).reshape(B, S, h, d_k).transpose(0, 2, 1, 3)
    K = (n @ wk.T).reshape(B, S, h, d_k).transpose(0, 2, 1, 3)
    V = (n @ wv.T).reshape(B, S, h, d_k).transpose(0, 2, 1, 3)
    s = jnp.einsum('bhqd,bhkd->bhqk', Q, K) / math.sqrt(d_k)
    a = jax.nn.softmax(s, axis=-1)
    c = jnp.einsum('bhqk,bhkd->bhqd', a, V).transpose(0, 2, 1, 3).reshape(B, S, D)
    return x + c @ wo.T


if __name__ == "__main__":
    B, S, d_model, h = 2, 8, 32, 4

    key = jax.random.PRNGKey(0)
    kx, k1, k2, k3, k4, k5, k6 = jax.random.split(key, 7)

    x = jax.random.normal(kx, (B, S, d_model), dtype=jnp.float32)

    lim = 1.0 / math.sqrt(d_model)
    wq = jax.random.uniform(k1, (d_model, d_model), jnp.float32, -lim, lim)
    wk = jax.random.uniform(k2, (d_model, d_model), jnp.float32, -lim, lim)
    wv = jax.random.uniform(k3, (d_model, d_model), jnp.float32, -lim, lim)
    wo = jax.random.uniform(k4, (d_model, d_model), jnp.float32, -lim, lim)
    alpha = 1.0 + 0.1 * jax.random.normal(k5, (d_model,), jnp.float32)
    bias = 0.1 * jax.random.normal(k6, (d_model,), jnp.float32)

    out = residual_mha_forward(x, alpha, bias, wq, wk, wv, wo, h)
    out = jax.block_until_ready(out)

    ref = residual_mha_reference(x, alpha, bias, wq, wk, wv, wo, h)
    assert out.shape == ref.shape, "shape mismatch"
    max_err = float(jnp.max(jnp.abs(out - ref)))
    assert jnp.allclose(out, ref, rtol=5e-3, atol=5e-3), f"output mismatch, max abs err={max_err}"

    print("KERNEL_OK")
</pallas_src>

<mosaic_0001>
module attributes {stable_mosaic.version = 11 : i64} {
  func.func @_ln_qkv_kernel(%arg0: i32, %arg1: i32, %arg2: memref<1x8x32xf32, #tpu.memory_space<vmem>>, %arg3: memref<1x32xf32, #tpu.memory_space<vmem>>, %arg4: memref<1x32xf32, #tpu.memory_space<vmem>>, %arg5: memref<32x32xf32, #tpu.memory_space<vmem>>, %arg6: memref<32x32xf32, #tpu.memory_space<vmem>>, %arg7: memref<32x32xf32, #tpu.memory_space<vmem>>, %arg8: memref<1x4x8x8xf32, #tpu.memory_space<vmem>>, %arg9: memref<1x4x8x8xf32, #tpu.memory_space<vmem>>, %arg10: memref<1x4x8x8xf32, #tpu.memory_space<vmem>>) attributes {dimension_semantics = [#tpu.dimension_semantics<parallel>, #tpu.dimension_semantics<parallel>], iteration_bounds = array<i64: 2, 1>, scalar_prefetch = 0 : i64, scratch_operands = 0 : i64, tpu.core_type = #tpu.core_type<tc>, window_params = [{transform_indices = @transform_0, window_bounds = array<i64: 1, 8, 32>}, {pipeline_mode = #tpu.pipeline_mode<synchronous>, transform_indices = @transform_1, window_bounds = array<i64: 1, 32>}, {pipeline_mode = #tpu.pipeline_mode<synchronous>, transform_indices = @transform_2, window_bounds = array<i64: 1, 32>}, {pipeline_mode = #tpu.pipeline_mode<synchronous>, transform_indices = @transform_3, window_bounds = array<i64: 32, 32>}, {pipeline_mode = #tpu.pipeline_mode<synchronous>, transform_indices = @transform_4, window_bounds = array<i64: 32, 32>}, {pipeline_mode = #tpu.pipeline_mode<synchronous>, transform_indices = @transform_5, window_bounds = array<i64: 32, 32>}, {transform_indices = @transform_6, window_bounds = array<i64: 1, 4, 8, 8>}, {transform_indices = @transform_7, window_bounds = array<i64: 1, 4, 8, 8>}, {transform_indices = @transform_8, window_bounds = array<i64: 1, 4, 8, 8>}]} {
    %c0 = arith.constant 0 : index
    %c0_0 = arith.constant 0 : index
    %c0_1 = arith.constant 0 : index
    %0 = vector.load %arg2[%c0, %c0_0, %c0_1] : memref<1x8x32xf32, #tpu.memory_space<vmem>>, vector<1x8x32xf32>
    %1 = vector.shape_cast %0 : vector<1x8x32xf32> to vector<8x32xf32>
    %cst = arith.constant dense<0.000000e+00> : vector<8xf32>
    %2 = vector.multi_reduction <add>, %1, %cst [1] : vector<8x32xf32> to vector<8xf32>
    %3 = vector.shape_cast %2 : vector<8xf32> to vector<8x1xf32>
    %cst_2 = arith.constant 3.200000e+01 : f32
    %4 = vector.broadcast %cst_2 : f32 to vector<8x1xf32>
    %5 = arith.divf %3, %4 : vector<8x1xf32>
    %6 = vector.broadcast %5 : vector<8x1xf32> to vector<8x32xf32>
    %7 = arith.subf %1, %6 : vector<8x32xf32>
    %8 = arith.mulf %7, %7 : vector<8x32xf32>
    %cst_3 = arith.constant dense<0.000000e+00> : vector<8xf32>
    %9 = vector.multi_reduction <add>, %8, %cst_3 [1] : vector<8x32xf32> to vector<8xf32>
    %10 = vector.shape_cast %9 : vector<8xf32> to vector<8x1xf32>
    %cst_4 = arith.constant 0.0322580636 : f32
    %11 = vector.broadcast %cst_4 : f32 to vector<8x1xf32>
    %12 = arith.mulf %10, %11 : vector<8x1xf32>
    %13 = math.sqrt %12 : vector<8x1xf32>
    %cst_5 = arith.constant 9.99999997E-7 : f32
    %14 = vector.broadcast %cst_5 : f32 to vector<8x1xf32>
    %15 = arith.addf %13, %14 : vector<8x1xf32>
    %cst_6 = arith.constant 1.000000e+00 : f32
    %16 = vector.broadcast %cst_6 : f32 to vector<8x1xf32>
    %17 = arith.divf %16, %15 : vector<8x1xf32>
    %18 = vector.broadcast %17 : vector<8x1xf32> to vector<8x32xf32>
    %19 = arith.mulf %7, %18 : vector<8x32xf32>
    %c0_7 = arith.constant 0 : index
    %c0_8 = arith.constant 0 : index
    %20 = vector.load %arg3[%c0_7, %c0_8] : memref<1x32xf32, #tpu.memory_space<vmem>>, vector<1x32xf32>
    %21 = vector.broadcast %20 : vector<1x32xf32> to vector<8x32xf32>
    %22 = arith.mulf %19, %21 : vector<8x32xf32>
    %c0_9 = arith.constant 0 : index
    %c0_10 = arith.constant 0 : index
    %23 = vector.load %arg4[%c0_9, %c0_10] : memref<1x32xf32, #tpu.memory_space<vmem>>, vector<1x32xf32>
    %24 = vector.broadcast %23 : vector<1x32xf32> to vector<8x32xf32>
    %25 = arith.addf %22, %24 : vector<8x32xf32>
    %c0_11 = arith.constant 0 : index
    %c0_12 = arith.constant 0 : index
    %26 = vector.load %arg5[%c0_11, %c0_12] : memref<32x32xf32, #tpu.memory_space<vmem>>, vector<32x32xf32>
    %cst_13 = arith.constant dense<0.000000e+00> : vector<8x32xf32>
    %27 = tpu.matmul %25, %26, %cst_13 {dimension_numbers = #tpu.dot_dimension_numbers<[1], [0], [0], [1], [0, 0, 1, 1], [], []>} : vector<8x32xf32>, vector<32x32xf32>, vector<8x32xf32> -> vector<8x32xf32>
    %c0_14 = arith.constant 0 : index
    %c0_15 = arith.constant 0 : index
    %28 = vector.load %arg6[%c0_14, %c0_15] : memref<32x32xf32, #tpu.memory_space<vmem>>, vector<32x32xf32>
    %cst_16 = arith.constant dense<0.000000e+00> : vector<8x32xf32>
    %29 = tpu.matmul %25, %28, %cst_16 {dimension_numbers = #tpu.dot_dimension_numbers<[1], [0], [0], [1], [0, 0, 1, 1], [], []>} : vector<8x32xf32>, vector<32x32xf32>, vector<8x32xf32> -> vector<8x32xf32>
    %c0_17 = arith.constant 0 : index
    %c0_18 = arith.constant 0 : index
    %30 = vector.load %arg7[%c0_17, %c0_18] : memref<32x32xf32, #tpu.memory_space<vmem>>, vector<32x32xf32>
    %cst_19 = arith.constant dense<0.000000e+00> : vector<8x32xf32>
    %31 = tpu.matmul %25, %30, %cst_19 {dimension_numbers = #tpu.dot_dimension_numbers<[1], [0], [0], [1], [0, 0, 1, 1], [], []>} : vector<8x32xf32>, vector<32x32xf32>, vector<8x32xf32> -> vector<8x32xf32>
    %32 = vector.extract_strided_slice %27 {offsets = [0, 0], sizes = [8, 8], strides = [1, 1]} : vector<8x32xf32> to vector<8x8xf32>
    %c0_20 = arith.constant 0 : index
    %c0_21 = arith.constant 0 : index
    %c0_22 = arith.constant 0 : index
    %c0_23 = arith.constant 0 : index
    %33 = vector.load %arg8[%c0_20, %c0_21, %c0_22, %c0_23] : memref<1x4x8x8xf32, #tpu.memory_space<vmem>>, vector<1x1x8x8xf32>
    %34 = vector.shape_cast %33 : vector<1x1x8x8xf32> to vector<8x8xf32>
    %35 = vector.shape_cast %32 : vector<8x8xf32> to vector<1x1x8x8xf32>
    tpu.vector_store %arg8[%c0_20, %c0_21, %c0_22, %c0_23], %35 {strides = array<i32>} : memref<1x4x8x8xf32, #tpu.memory_space<vmem>>, vector<1x1x8x8xf32>,
    %36 = vector.extract_strided_slice %29 {offsets = [0, 0], sizes = [8, 8], strides = [1, 1]} : vector<8x32xf32> to vector<8x8xf32>
    %c0_24 = arith.constant 0 : index
    %c0_25 = arith.constant 0 : index
    %c0_26 = arith.constant 0 : index
    %c0_27 = arith.constant 0 : index
    %37 = vector.load %arg9[%c0_24, %c0_25, %c0_26, %c0_27] : memref<1x4x8x8xf32, #tpu.memory_space<vmem>>, vector<1x1x8x8xf32>
    %38 = vector.shape_cast %37 : vector<1x1x8x8xf32> to vector<8x8xf32>
    %39 = vector.shape_cast %36 : vector<8x8xf32> to vector<1x1x8x8xf32>
    tpu.vector_store %arg9[%c0_24, %c0_25, %c0_26, %c0_27], %39 {strides = array<i32>} : memref<1x4x8x8xf32, #tpu.memory_space<vmem>>, vector<1x1x8x8xf32>,
    %40 = vector.extract_strided_slice %31 {offsets = [0, 0], sizes = [8, 8], strides = [1, 1]} : vector<8x32xf32> to vector<8x8xf32>
    %c0_28 = arith.constant 0 : index
    %c0_29 = arith.constant 0 : index
    %c0_30 = arith.constant 0 : index
    %c0_31 = arith.constant 0 : index
    %41 = vector.load %arg10[%c0_28, %c0_29, %c0_30, %c0_31] : memref<1x4x8x8xf32, #tpu.memory_space<vmem>>, vector<1x1x8x8xf32>
    %42 = vector.shape_cast %41 : vector<1x1x8x8xf32> to vector<8x8xf32>
    %43 = vector.shape_cast %40 : vector<8x8xf32> to vector<1x1x8x8xf32>
    tpu.vector_store %arg10[%c0_28, %c0_29, %c0_30, %c0_31], %43 {strides = array<i32>} : memref<1x4x8x8xf32, #tpu.memory_space<vmem>>, vector<1x1x8x8xf32>,
    %44 = vector.extract_strided_slice %27 {offsets = [0, 8], sizes = [8, 8], strides = [1, 1]} : vector<8x32xf32> to vector<8x8xf32>
    %c0_32 = arith.constant 0 : index
    %c1 = arith.constant 1 : index
    %c0_33 = arith.constant 0 : index
    %c0_34 = arith.constant 0 : index
    %45 = vector.load %arg8[%c0_32, %c1, %c0_33, %c0_34] : memref<1x4x8x8xf32, #tpu.memory_space<vmem>>, vector<1x1x8x8xf32>
    %46 = vector.shape_cast %45 : vector<1x1x8x8xf32> to vector<8x8xf32>
    %47 = vector.shape_cast %44 : vector<8x8xf32> to vector<1x1x8x8xf32>
    tpu.vector_store %arg8[%c0_32, %c1, %c0_33, %c0_34], %47 {strides = array<i32>} : memref<1x4x8x8xf32, #tpu.memory_space<vmem>>, vector<1x1x8x8xf32>,
    %48 = vector.extract_strided_slice %29 {offsets = [0, 8], sizes = [8, 8], strides = [1, 1]} : vector<8x32xf32> to vector<8x8xf32>
    %c0_35 = arith.constant 0 : index
    %c1_36 = arith.constant 1 : index
    %c0_37 = arith.constant 0 : index
    %c0_38 = arith.constant 0 : index
    %49 = vector.load %arg9[%c0_35, %c1_36, %c0_37, %c0_38] : memref<1x4x8x8xf32, #tpu.memory_space<vmem>>, vector<1x1x8x8xf32>
    %50 = vector.shape_cast %49 : vector<1x1x8x8xf32> to vector<8x8xf32>
    %51 = vector.shape_cast %48 : vector<8x8xf32> to vector<1x1x8x8xf32>
    tpu.vector_store %arg9[%c0_35, %c1_36, %c0_37, %c0_38], %51 {strides = array<i32>} : memref<1x4x8x8xf32, #tpu.memory_space<vmem>>, vector<1x1x8x8xf32>,
    %52 = vector.extract_strided_slice %31 {offsets = [0, 8], sizes = [8, 8], strides = [1, 1]} : vector<8x32xf32> to vector<8x8xf32>
    %c0_39 = arith.constant 0 : index
    %c1_40 = arith.constant 1 : index
    %c0_41 = arith.constant 0 : index
    %c0_42 = arith.constant 0 : index
    %53 = vector.load %arg10[%c0_39, %c1_40, %c0_41, %c0_42] : memref<1x4x8x8xf32, #tpu.memory_space<vmem>>, vector<1x1x8x8xf32>
    %54 = vector.shape_cast %53 : vector<1x1x8x8xf32> to vector<8x8xf32>
    %55 = vector.shape_cast %52 : vector<8x8xf32> to vector<1x1x8x8xf32>
    tpu.vector_store %arg10[%c0_39, %c1_40, %c0_41, %c0_42], %55 {strides = array<i32>} : memref<1x4x8x8xf32, #tpu.memory_space<vmem>>, vector<1x1x8x8xf32>,
    %56 = vector.extract_strided_slice %27 {offsets = [0, 16], sizes = [8, 8], strides = [1, 1]} : vector<8x32xf32> to vector<8x8xf32>
    %c0_43 = arith.constant 0 : index
    %c2 = arith.constant 2 : index
    %c0_44 = arith.constant 0 : index
    %c0_45 = arith.constant 0 : index
    %57 = vector.load %arg8[%c0_43, %c2, %c0_44, %c0_45] : memref<1x4x8x8xf32, #tpu.memory_space<vmem>>, vector<1x1x8x8xf32>
    %58 = vector.shape_cast %57 : vector<1x1x8x8xf32> to vector<8x8xf32>
    %59 = vector.shape_cast %56 : vector<8x8xf32> to vector<1x1x8x8xf32>
    tpu.vector_store %arg8[%c0_43, %c2, %c0_44, %c0_45], %59 {strides = array<i32>} : memref<1x4x8x8xf32, #tpu.memory_space<vmem>>, vector<1x1x8x8xf32>,
    %60 = vector.extract_strided_slice %29 {offsets = [0, 16], sizes = [8, 8], strides = [1, 1]} : vector<8x32xf32> to vector<8x8xf32>
    %c0_46 = arith.constant 0 : index
    %c2_47 = arith.constant 2 : index
    %c0_48 = arith.constant 0 : index
    %c0_49 = arith.constant 0 : index
    %61 = vector.load %arg9[%c0_46, %c2_47, %c0_48, %c0_49] : memref<1x4x8x8xf32, #tpu.memory_space<vmem>>, vector<1x1x8x8xf32>
    %62 = vector.shape_cast %61 : vector<1x1x8x8xf32> to vector<8x8xf32>
    %63 = vector.shape_cast %60 : vector<8x8xf32> to vector<1x1x8x8xf32>
    tpu.vector_store %arg9[%c0_46, %c2_47, %c0_48, %c0_49], %63 {strides = array<i32>} : memref<1x4x8x8xf32, #tpu.memory_space<vmem>>, vector<1x1x8x8xf32>,
    %64 = vector.extract_strided_slice %31 {offsets = [0, 16], sizes = [8, 8], strides = [1, 1]} : vector<8x32xf32> to vector<8x8xf32>
    %c0_50 = arith.constant 0 : index
    %c2_51 = arith.constant 2 : index
    %c0_52 = arith.constant 0 : index
    %c0_53 = arith.constant 0 : index
    %65 = vector.load %arg10[%c0_50, %c2_51, %c0_52, %c0_53] : memref<1x4x8x8xf32, #tpu.memory_space<vmem>>, vector<1x1x8x8xf32>
    %66 = vector.shape_cast %65 : vector<1x1x8x8xf32> to vector<8x8xf32>
    %67 = vector.shape_cast %64 : vector<8x8xf32> to vector<1x1x8x8xf32>
    tpu.vector_store %arg10[%c0_50, %c2_51, %c0_52, %c0_53], %67 {strides = array<i32>} : memref<1x4x8x8xf32, #tpu.memory_space<vmem>>, vector<1x1x8x8xf32>,
    %68 = vector.extract_strided_slice %27 {offsets = [0, 24], sizes = [8, 8], strides = [1, 1]} : vector<8x32xf32> to vector<8x8xf32>
    %c0_54 = arith.constant 0 : index
    %c3 = arith.constant 3 : index
    %c0_55 = arith.constant 0 : index
    %c0_56 = arith.constant 0 : index
    %69 = vector.load %arg8[%c0_54, %c3, %c0_55, %c0_56] : memref<1x4x8x8xf32, #tpu.memory_space<vmem>>, vector<1x1x8x8xf32>
    %70 = vector.shape_cast %69 : vector<1x1x8x8xf32> to vector<8x8xf32>
    %71 = vector.shape_cast %68 : vector<8x8xf32> to vector<1x1x8x8xf32>
    tpu.vector_store %arg8[%c0_54, %c3, %c0_55, %c0_56], %71 {strides = array<i32>} : memref<1x4x8x8xf32, #tpu.memory_space<vmem>>, vector<1x1x8x8xf32>,
    %72 = vector.extract_strided_slice %29 {offsets = [0, 24], sizes = [8, 8], strides = [1, 1]} : vector<8x32xf32> to vector<8x8xf32>
    %c0_57 = arith.constant 0 : index
    %c3_58 = arith.constant 3 : index
    %c0_59 = arith.constant 0 : index
    %c0_60 = arith.constant 0 : index
    %73 = vector.load %arg9[%c0_57, %c3_58, %c0_59, %c0_60] : memref<1x4x8x8xf32, #tpu.memory_space<vmem>>, vector<1x1x8x8xf32>
    %74 = vector.shape_cast %73 : vector<1x1x8x8xf32> to vector<8x8xf32>
    %75 = vector.shape_cast %72 : vector<8x8xf32> to vector<1x1x8x8xf32>
    tpu.vector_store %arg9[%c0_57, %c3_58, %c0_59, %c0_60], %75 {strides = array<i32>} : memref<1x4x8x8xf32, #tpu.memory_space<vmem>>, vector<1x1x8x8xf32>,
    %76 = vector.extract_strided_slice %31 {offsets = [0, 24], sizes = [8, 8], strides = [1, 1]} : vector<8x32xf32> to vector<8x8xf32>
    %c0_61 = arith.constant 0 : index
    %c3_62 = arith.constant 3 : index
    %c0_63 = arith.constant 0 : index
    %c0_64 = arith.constant 0 : index
    %77 = vector.load %arg10[%c0_61, %c3_62, %c0_63, %c0_64] : memref<1x4x8x8xf32, #tpu.memory_space<vmem>>, vector<1x1x8x8xf32>
    %78 = vector.shape_cast %77 : vector<1x1x8x8xf32> to vector<8x8xf32>
    %79 = vector.shape_cast %76 : vector<8x8xf32> to vector<1x1x8x8xf32>
    tpu.vector_store %arg10[%c0_61, %c3_62, %c0_63, %c0_64], %79 {strides = array<i32>} : memref<1x4x8x8xf32, #tpu.memory_space<vmem>>, vector<1x1x8x8xf32>,
    return
  }
  func.func @transform_0(%arg0: i32, %arg1: i32) -> (i32, i32, i32) {
    %c0_i32 = arith.constant 0 : i32
    %c0_i32_0 = arith.constant 0 : i32
    return %arg0, %arg1, %c0_i32 : i32, i32, i32
  }
  func.func @transform_1(%arg0: i32, %arg1: i32) -> (i32, i32) {
    %c0_i32 = arith.constant 0 : i32
    %c0_i32_0 = arith.constant 0 : i32
    %c0_i32_1 = arith.constant 0 : i32
    return %c0_i32, %c0_i32_0 : i32, i32
  }
  func.func @transform_2(%arg0: i32, %arg1: i32) -> (i32, i32) {
    %c0_i32 = arith.constant 0 : i32
    %c0_i32_0 = arith.constant 0 : i32
    %c0_i32_1 = arith.constant 0 : i32
    return %c0_i32, %c0_i32_0 : i32, i32
  }
  func.func @transform_3(%arg0: i32, %arg1: i32) -> (i32, i32) {
    %c0_i32 = arith.constant 0 : i32
    %c0_i32_0 = arith.constant 0 : i32
    %c0_i32_1 = arith.constant 0 : i32
    return %c0_i32, %c0_i32_0 : i32, i32
  }
  func.func @transform_4(%arg0: i32, %arg1: i32) -> (i32, i32) {
    %c0_i32 = arith.constant 0 : i32
    %c0_i32_0 = arith.constant 0 : i32
    %c0_i32_1 = arith.constant 0 : i32
    return %c0_i32, %c0_i32_0 : i32, i32
  }
  func.func @transform_5(%arg0: i32, %arg1: i32) -> (i32, i32) {
    %c0_i32 = arith.constant 0 : i32
    %c0_i32_0 = arith.constant 0 : i32
    %c0_i32_1 = arith.constant 0 : i32
    return %c0_i32, %c0_i32_0 : i32, i32
  }
  func.func @transform_6(%arg0: i32, %arg1: i32) -> (i32, i32, i32, i32) {
    %c0_i32 = arith.constant 0 : i32
    %c0_i32_0 = arith.constant 0 : i32
    %c0_i32_1 = arith.constant 0 : i32
    return %arg0, %c0_i32, %arg1, %c0_i32_0 : i32, i32, i32, i32
  }
  func.func @transform_7(%arg0: i32, %arg1: i32) -> (i32, i32, i32, i32) {
    %c0_i32 = arith.constant 0 : i32
    %c0_i32_0 = arith.constant 0 : i32
    %c0_i32_1 = arith.constant 0 : i32
    return %arg0, %c0_i32, %arg1, %c0_i32_0 : i32, i32, i32, i32
  }
  func.func @transform_8(%arg0: i32, %arg1: i32) -> (i32, i32, i32, i32) {
    %c0_i32 = arith.constant 0 : i32
    %c0_i32_0 = arith.constant 0 : i32
    %c0_i32_1 = arith.constant 0 : i32
    return %arg0, %c0_i32, %arg1, %c0_i32_0 : i32, i32, i32, i32
  }
}

</mosaic_0001>

<bundles_post_ra>
// kernel: tpu_custom_call.1
= control target key start
LH: loop header
LB: loop body
LE: loop exit
PB: predicated region body
PF: predicated region fallthrough
CT: control target
= control target key end

     0   :  { %s1665_s0 = inlined_call_operand.hbm [shape: f32[2,8,32], index: 0, kind: input, shape index: {}]   ;;  %s1666_s1 = inlined_call_operand.hbm [shape: f32[1,32], index: 1, kind: input, shape index: {}]   ;;  %s1667_s2 = inlined_call_operand.vmem [shape: f32[1,32], index: 2, kind: input, shape index: {}]   ;;  %s1668_s3 = inlined_call_operand.hbm [shape: f32[32,32], index: 3, kind: input, shape index: {}]   ;;  %s1669_s4 = inlined_call_operand.hbm [shape: f32[32,32], index: 4, kind: input, shape index: {}]   ;;  %s1670_s5 = inlined_call_operand.hbm [shape: f32[32,32], index: 5, kind: input, shape index: {}]   ;;  %s1671_s6 = inlined_call_operand.hbm [shape: f32[2,4,8,8], index: 6, kind: output, shape index: {0}]   ;;  %s1672_s7 = inlined_call_operand.hbm [shape: f32[2,4,8,8], index: 7, kind: output, shape index: {1}]   ;;  %s1673_s8 = inlined_call_operand.hbm [shape: f32[2,4,8,8], index: 8, kind: output, shape index: {2}]  }
   0x1   :  { %1675 = sst [smem:[#allocation20_spill]] %s1665_s0 }
   0x2   :  { %1676 = sst [smem:[#allocation21_spill]] %s1666_s1 }
   0x3   :  { %1677 = sst [smem:[#allocation22_spill]] %s1667_s2 }
   0x4   :  { %1678 = sst [smem:[#allocation23_spill]] %s1668_s3 }
   0x5   :  { %1679 = sst [smem:[#allocation24_spill]] %s1669_s4 }
   0x6   :  { %14 = vsyncpa [#allocation3], 0 }
   0x7   :  { %16 = vsyncpa [#allocation3 + $0x1], 0 }
   0x8   :  { %17 = vsyncpa [#allocation6], 0 }
   0x9   :  { %18 = vsyncpa [#allocation9], 0 }
   0xa   :  { %19 = vsyncpa [#allocation4], 0 }
   0xb   :  { %21 = vsyncpa [#allocation4 + $0x1], 0 }
   0xc   :  { %22 = vsyncpa [#allocation13], 0 }
   0xd   :  { %24 = vsyncpa [#allocation13 + $0x1], 0  ;;  %s1396_s27 = smov 0   ;;  %s1398_s28 = smov 0  }
   0xe   :  { %s1400_s29 = smov 0   ;;  %s1402_s30 = smov 0  }
   0xf   :  { %s1404_s9 = smov 0   ;;  %s1406_s10 = smov 0  }
  0x10 LB: > { %s1427_s11 = sadd.s32 4294967295, %s1337_s10   ;;  %p865_p0 = scmp.ge.s32.totalorder %s1337_s10, 1  ;;  %s1337_s10 = sphi %s1406_s10, %s30_s10   ;;  %s1333_s9 = sphi %s1404_s9, %s1695_s9   ;;  %s1329_s30 = sphi %s1402_s30, %s1694_s30   ;;  %s1325_s29 = sphi %s1400_s29, %s1693_s29   ;;  %s1321_s28 = sphi %s1398_s28, %s1692_s28   ;;  %s1317_s27 = sphi %s1396_s27, %s1691_s27  }
  0x11   : > { %p65_p1 = scmp.eq.s32.totalorder %s1427_s11, 0  ;;  %p264_p2 = scmp.lt.s32.totalorder %s1337_s10, 3 }
  0x12   : > { %s1680_s1 = sld [smem:[#allocation21_spill]]  ;;  %p870_p4 = scmp.ge.s32.totalorder %s1337_s10, 2 }
  0x13   : > { %p1435_p3 = pnand %p865_p0, %p264_p2  ;;  %s1339_s16 = smov [#allocation5]  }
  0x14   : > { %s278_s17 = sshll.u32 %s1339_s16, 4  ;;  %s1683_s4 = sld [smem:[#allocation24_spill]]  ;;  %s279_s17 = int_to_ptr.vmem [resolvable:$true] %s278_s17 }
  0x15   : > { %p932_p5 = pneg %p1435_p3  ;;  %s1340_s22 = smov [#allocation8]  }
  0x16   : > { %s306_s23 = sshll.u32 %s1340_s22, 4  ;;  %s1684_s3 = sld [smem:[#allocation23_spill]]  ;;  %s307_s23 = int_to_ptr.vmem [resolvable:$true] %s306_s23 }
  0x17   : > { %p1444_p6 = pnand %p932_p5, %p65_p1  ;;  %s1341_s12 = smov 128  }
  0x18   : > { %s276_s14 = sshll.u32 %s1680_s1, 4  ;;  %s1342_s13 = smov 8   ;;  %s277_s14 = int_to_ptr.hbm [resolvable:$true] %s276_s14 }
  0x19   : > { %935 = dma.hbm_to_vmem [thread:$0]  (!%p1444_p6), %s277_s14, 16, %s279_s17, [#allocation6]  }
  0x1a   : > { %s304_s21 = sshll.u32 %s1683_s4, 4  ;;  %s318_s17 = sshll.u32 %s1670_s5, 4  ;;  %s305_s21 = int_to_ptr.hbm [resolvable:$true] %s304_s21  ;;  %s319_s17 = int_to_ptr.hbm [resolvable:$true] %s318_s17 }
  0x1b   : > { %941 = dma.hbm_to_vmem [thread:$0]  (!%p1444_p6), %s305_s21, 512, %s307_s23, [#allocation9], %s1341_s12, %s1341_s12, %s1342_s13  }
  0x1c   : > { %s290_s26 = sshll.u32 %s1684_s3, 4  ;;  %s1343_s19 = smov [#allocation7]   ;;  %s291_s26 = int_to_ptr.hbm [resolvable:$true] %s290_s26 }
  0x1d   : > { %s292_s20 = sshll.u32 %s1343_s19, 4  ;;  %s1344_s22 = smov [#allocation10]   ;;  %s293_s20 = int_to_ptr.vmem [resolvable:$true] %s292_s20 }
  0x1e   : > { %938 = dma.hbm_to_vmem [thread:$0]  (!%p1444_p6), %s291_s26, 512, %s293_s20, [#allocation6], %s1341_s12, %s1341_s12, %s1342_s13  }
  0x1f   : > { %s320_s24 = sshll.u32 %s1344_s22, 4  ;;  %s42_s21 = sadd.s32 1, %s1333_s9  ;;  %s321_s24 = int_to_ptr.vmem [resolvable:$true] %s320_s24 }
  0x20   : > { %944 = dma.hbm_to_vmem [thread:$0]  (!%p1444_p6), %s319_s17, 512, %s321_s24, [#allocation9], %s1341_s12, %s1341_s12, %s1342_s13  }
  0x21   : > { %s1674_s23 = sadd.s32 4294967294, %s1337_s10   ;;  %p44_p7 = scmp.ge.s32.totalorder %s42_s21, 2 }
  0x22   : > { %s51_s25 = sadd.s32 1, %s1325_s29  ;;  %p58_p8 = scmp.ne.s32.totalorder %s1325_s29, %s1321_s28 }
  0x23   : > { %s1697_s21 = smov (%p44_p7, %s42_s21), 0  ;;  %p59_p9 = scmp.eq.s32.totalorder %s1337_s10, 0 }
  0x24   : > { %p64_p10 = scmp.ne.s32.totalorder %s1321_s28, %s1317_s27  ;;  %s46_s26 = ssub.s32 %s1333_s9, %s1697_s21 }
  0x25   : > { %p195_p11 = scmp.eq.s32.totalorder %s1427_s11, 1  ;;  %p49_p12 = scmp.eq.s32.totalorder %s46_s26, 0 }
  0x26   : > { %p1480_p13 = por %p65_p1, %p64_p10  ;;  %p201_p2 = scmp.eq.s32.totalorder %s1674_s23, 1 }
  0x27   : > { %p1484_p0 = por %p195_p11, %p58_p8  ;;  %p60_p5 = por %p59_p9, %p58_p8 }
  0x28   : > { %s1491_s13 = scalar_select %p49_p12, %s1325_s29, %s51_s25  }
  0x29   : > { %p1493_p6 = por %p201_p2, %p64_p10  ;;  %s334_s14 = sand.u32 1, %s1325_s29  }
  0x2a   : > { %s872_s17 = sshll.u32 %s1333_s9, 3  ;;  %p963_p7 = scmp.lt.s32.totalorder %s1337_s10, 2 }
  0x2b   : > { %s871_s19 = sshll.u32 %s334_s14, 3  ;;  %s1688_s0 = sld [smem:[#allocation20_spill]] }
  0x2c   : > { %s338_s1 = scalar_lea.vmem [#allocation2], %s871_s19  ;;  %p946_p11 = pnand %p963_p7, %p60_p5 }
  0x2d   : > { %s347_s3 = sshll.u32 %s338_s1, 4  ;;  %s335_s25 = scalar_lea.sflag [#allocation3], %s334_s14  ;;  %s348_s3 = int_to_ptr.vmem [resolvable:$true] %s347_s3 }
  0x2e   : > { %s1506_s23 = sand.u32 (!%p1435_p3), 1, %s1321_s28  }
  0x2f   : > { %356 = sbr.rel (%p1435_p3) target bundleno = 625 (0x271), region = 44  ;;  %s874_s4 = sshll.u32 (!%p1435_p3), %s1506_s23, 3 }
  0x30   : > { %s359_s20 = scalar_lea.sflag (!%p1435_p3), [#allocation3], %s1506_s23 }
  0x31   : > { %s343_s24 = scalar_lea.hbm %s1688_s0, %s872_s17  ;;  %s362_s17 = scalar_lea.vmem (!%p1435_p3), [#allocation2], %s874_s4 }
  0x32   : > { %s345_s26 = sshll.u32 %s343_s24, 4  ;;  %s346_s26 = int_to_ptr.hbm [resolvable:$true] %s345_s26 }
  0x33   : > { %948 = dma.hbm_to_vmem [thread:$0]  (!%p946_p11), %s346_s26, 128, %s348_s3, %s335_s25  }
  0x34   : > { %1296 = dma.done.wait (%p1480_p13), %s359_s20, 128  }
  0x35   : > { %1298 = vsyncadd (%p1480_p13), %s359_s20, 4294967168 }
  0x36   : > { %1300 = dma.done.wait (%p65_p1), [#allocation6], 528  }
  0x37   : > { %1302 = vsyncadd (%p65_p1), [#allocation6], 4294966768 }
  0x38   : > { %1304 = dma.done.wait (%p65_p1), [#allocation9], 1024  }
  0x39   : > { %1306 = vsyncadd (%p65_p1), [#allocation9], 4294966272  ;;  %vm427_vm0 = vcmask 261120   ;;  %v426_v0 = vld [vmem:[%s362_s17] sm:$0xff]  ;;  %v1345_v2 = vmov 32.0   ;;  %v484_v23 = vld [vmem:[#allocation7] sm:$0xff] }
  0x3a   : > { %v428_v1 = vsel %vm427_vm0, %v426_v0, 0.0  ;;  %1031 = vrcp.f32 %v1345_v2  ;;  %v487_v14 = vld [vmem:[#allocation7 + $0x18] sm:$0xff]  ;;  %v486_v17 = vld [vmem:[#allocation7 + $0x10] sm:$0xff]  ;;  %v485_v20 = vld [vmem:[#allocation7 + $0x8] sm:$0xff]  ;;  %s1689_s2 = sld [smem:[#allocation22_spill]]  ;;  %s879_s4 = sshll.u32 %s1506_s23, 5 }
  0x3b   : > { %429 = vadd.xlane.f32.xlu0 %v428_v1  ;;  %v514_v15 = vld [vmem:[#allocation8 + $0x18] sm:$0xff]  ;;  %503 = vmatpush.msra.mxu0 %v487_v14  ;;  %v513_v18 = vld [vmem:[#allocation8 + $0x10] sm:$0xff]  ;;  %v512_v21 = vld [vmem:[#allocation8 + $0x8] sm:$0xff]  ;;  %vm559_vm8 = vcmask 64512   ;;  %s1531_s15 = scalar_lea.vmem [#allocation11], %s879_s4  ;;  %s1346_s18 = smov 104  }
  0x3c   : > { %v538_v16 = vld [vmem:[#allocation10 + $0x18] sm:$0xff]  ;;  %527 = vmatpush.msra.mxu1 %v514_v15  ;;  %v537_v19 = vld [vmem:[#allocation10 + $0x10] sm:$0xff]  ;;  %v536_v22 = vld [vmem:[#allocation10 + $0x8] sm:$0xff]  ;;  %s1347_s14 = smov 120   ;;  %s1535_s19 = scalar_lea.vmem [#allocation12], %s879_s4 }
  0x3d   : > { %551 = vmatpush.msra.mxu2 %v538_v16  ;;  %504 = vmatpush.msra.mxu0 %v486_v17  ;;  %v511_v24 = vld [vmem:[#allocation8] sm:$0xff]  ;;  %v1029_v48 = vld [vmem:[#allocation5] ss:$0 sm:$0xff]  ;;  %s1539_s22 = scalar_lea.vmem [#allocation14], %s879_s4  ;;  %s1348_s24 = smov 112  }
  0x3e   : > { %528 = vmatpush.msra.mxu1 %v513_v18  ;;  %v535_v25 = vld [vmem:[#allocation10] sm:$0xff]  ;;  %s1550_s26 = sshll.u32 %s1329_s30, 5  ;;  %s653_s25 = sshll.u32 %s1535_s19, 4  ;;  %s1566_s25 = int_to_ptr.vmem [resolvable:$true] %s653_s25 }
  0x3f   : > { %552 = vmatpush.msra.mxu2 %v537_v19  ;;  %505 = vmatpush.msra.mxu0 %v485_v20  ;;  %s652_s1 = scalar_lea.hbm %s1672_s7, %s1550_s26  ;;  %s670_s30 = scalar_lea.hbm %s1673_s8, %s1550_s26 }
  0x40   : > { %v1032_v3 = vpop.eup %1031  ;;  %529 = vmatpush.msra.mxu1 %v512_v21  ;;  %v1030_v51 = vld [vmem:[%s1689_s2] ss:$0 sm:$0xff]  ;;  %s1571_s0 = sshll.u32 %s670_s30, 4  ;;  %s1207_s4 = scalar_lea.hbm %s1672_s7, 64  ;;  %s674_s0 = int_to_ptr.hbm [resolvable:$true] %s1571_s0 }
  0x41   : > { %v432_v4 = vmul.f32 32.0, %v1032_v3  ;;  %vm436_vm1 = vweird.f32 %v1032_v3  ;;  %553 = vmatpush.msra.mxu2 %v536_v22  ;;  %506 = vmatpush.msra.mxu0 %v484_v23 }
  0x42   : > { %530 = vmatpush.msra.mxu1 %v511_v24 }
  0x43   : > { %v433_v5 = vsub.f32 1.0, %v432_v4  ;;  %554 = vmatpush.msra.mxu2 %v535_v25 }
  0x45   : > { %v434_v6 = vmul.f32 %v1032_v3, %v433_v5 }
  0x47   : > { %v435_v7 = vadd.f32 %v1032_v3, %v434_v6 }
  0x49   : > { %v437_v8 = vsel %vm436_vm1, %v1032_v3, %v435_v7 }
  0xae   : > { %v430_v9 = vpop.xlane.xlu0 %429 }
  0xaf   : > { %v438_v10 = vmul.f32 %v437_v8, %v430_v9 }
  0xb1   : > { %v439_v11 = vsub.f32 %v426_v0, %v438_v10 }
  0xb3   : > { %v440_v12 = vmul.f32 %v439_v11, %v439_v11 }
  0xb5   : > { %v441_v13 = vsel %vm427_vm0, %v440_v12, 0.0 }
  0xb6   : > { %442 = vadd.xlane.f32.xlu0 %v441_v13 }
 0x129   : > { %v443_v26 = vpop.xlane.xlu0 %442 }
 0x12a   : > { %v444_v27 = vmul.f32 0.032258064, %v443_v26 }
 0x12c   : > { %1033 = vrsqrt.f32 %v444_v27  ;;  %vm452_vm2 = vcmp.eq.f32.partialorder %v444_v27, inf  ;;  %v455_v35 = vand.u32 2147483648, %v444_v27  ;;  %vm454_vm3 = vcmp.eq.f32.partialorder %v444_v27, 0.0 }
 0x132   : > { %v1034_v28 = vpop.eup %1033 }
 0x133   : > { %v446_v29 = vmul.f32 %v1034_v28, %v444_v27 }
 0x135   : > { %v447_v30 = vmul.f32 %v1034_v28, %v446_v29 }
 0x137   : > { %v448_v31 = vmul.f32 0.5, %v447_v30 }
 0x139   : > { %v449_v32 = vsub.f32 1.5, %v448_v31 }
 0x13b   : > { %v450_v33 = vmul.f32 %v1034_v28, %v449_v32 }
 0x13d   : > { %v451_v34 = vmul.f32 %v450_v33, %v444_v27 }
 0x13f   : > { %v453_v36 = vsel %vm452_vm2, %v444_v27, %v451_v34 }
 0x140   : > { %v456_v37 = vsel %vm454_vm3, %v455_v35, %v453_v36 }
 0x141   : > { %v457_v38 = vadd.f32 1e-06, %v456_v37 }
 0x143   : > { %1035 = vrcp.f32 %v457_v38  ;;  %v469_v42 = vand.u32 2147483648, %v457_v38  ;;  %v467_v44 = vand.u32 2147483647, %v457_v38  ;;  %vm463_vm5 = vweird.f32 %v457_v38 }
 0x145   : > { %v470_v46 = vor.u32 1.1754944e-38, %v469_v42  ;;  %vm468_vm7 = vcmp.eq.f32.partialorder %v467_v44, 8.507059e+37 }
 0x149   : > { %v1036_v39 = vpop.eup %1035 }
 0x14a   : > { %v459_v40 = vmul.f32 %v1036_v39, %v457_v38  ;;  %vm464_vm4 = vweird.f32 %v1036_v39 }
 0x14b   : > { %vm465_vm6 = vmor %vm463_vm5, %vm464_vm4 }
 0x14c   : > { %v460_v41 = vsub.f32 1.0, %v459_v40 }
 0x14e   : > { %v461_v43 = vmul.f32 %v1036_v39, %v460_v41 }
 0x150   : > { %v462_v45 = vadd.f32 %v1036_v39, %v461_v43 }
 0x152   : > { %v466_v47 = vsel %vm465_vm6, %v1036_v39, %v462_v45 }
 0x153   : > { %v471_v49 = vsel %vm468_vm7, %v470_v46, %v466_v47 }
 0x154   : > { %v473_v50 = vmul.f32 %v471_v49, %v439_v11 }
 0x156   : > { %v478_v52 = vmul.f32 %v1029_v48, %v473_v50 }
 0x158   : > { %v483_v53 = vadd.f32 %v1030_v51, %v478_v52 }
 0x15a   : > { %882 = vmatmul.msk.f32.vlgmr.msra.gmra.mxu0 %vm427_vm0, %v483_v53  ;;  %883 = vmatmul.msk.f32.vlgmr.msra.gmra.mxu1 %vm427_vm0, %v483_v53 }
 0x15b   : > { %884 = vmatmul.msk.f32.vlgmr.msra.gmra.mxu2 %vm427_vm0, %v483_v53 }
 0x1d7   : > { %v508_v54 = vpop.f32.mrf.mxu0  ;;  %v532_v55 = vpop.f32.mrf.mxu1 }
 0x1d8   : > { %560 = vst.msk [vmem:[%s1531_s15] sm:$0xff] %vm559_vm8, %v508_v54  ;;  %601 = vrot.lane.b32.xlu2 %v532_v55, %s1346_s18  ;;  %570 = vrot.lane.b32.xlu1 %v532_v55, %s1347_s14 }
 0x1d9   : > { %561 = vst.msk [vmem:[%s1535_s19] sm:$0xff] %vm559_vm8, %v532_v55 }
 0x1de   : > { %v556_v56 = vpop.f32.mrf.mxu2 }
 0x1df   : > { %562 = vst.msk [vmem:[%s1539_s22] sm:$0xff] %vm559_vm8, %v556_v56  ;;  %576 = vrot.lane.b32.xlu0 %v556_v56, %s1347_s14 }
 0x1e0   : > { %586 = vrot.lane.b32.xlu1 %v532_v55, %s1348_s24  ;;  %564 = vrot.lane.b32.xlu2 %v508_v54, %s1347_s14  ;;  %s1568_s14 = sshll.u32 %s652_s1, 4  ;;  %s656_s14 = int_to_ptr.hbm [resolvable:$true] %s1568_s14 }
 0x1e1   : > { %s1201_s20 = sshra.s32 %s656_s14, 4  ;;  %s1202_s20 = int_to_ptr.hbm [resolvable:$true] %s1201_s20 }
 0x1e2   : > { %s1203_s17 = scalar_lea.hbm %s1202_s20, 32  ;;  %p1208_p9 = scmp.lt.s32.totalorder %s1202_s20, %s1672_s7 }
 0x1e3   : > { %p1204_p1 = scmp.ne.s32.totalorder %s1202_s20, %s1203_s17  ;;  %p1209_p10 = scmp.lt.s32.totalorder %s1207_s4, %s1203_s17 }
 0x1e5   : > { %p1205_p3 = pnand %p1204_p1, %p1484_p0  ;;  %p1210_p12 = por %p1209_p10, %p1208_p9 }
 0x1e7   : > { %p1206_p8 = pneg %p1205_p3 }
 0x1e8   : > { %581 = vrot.lane.b32.xlu1 %v508_v54, %s1348_s24  ;;  %591 = vrot.lane.b32.xlu2 %v556_v56, %s1348_s24  ;;  %s671_s24 = sshll.u32 %s1539_s22, 4  ;;  %s1574_s24 = int_to_ptr.vmem [resolvable:$true] %s671_s24 }
 0x1e9   : > { %p1211_p13 = pnand %p1210_p12, %p1206_p8 }
 0x1f0   : > { %596 = vrot.lane.b32.xlu1 %v508_v54, %s1346_s18  ;;  %606 = vrot.lane.b32.xlu2 %v556_v56, %s1346_s18  ;;  %s616_s18 = sand.u32 1, %s1427_s11  }
 0x1f1   : > { %s1581_s11 = scalar_lea.sflag [#allocation13], %s616_s18 }
 0x232   : > { %v602_v57 = vpop.permute.xlu2 %601 }
 0x233   : > { %892 = vst.msk [vmem:[%s1535_s19 + $0x18] sm:$0xff] %vm559_vm8, %v602_v57 }
 0x23a   : > { %v565_v58 = vpop.permute.xlu2 %564 }
 0x23b   : > { %885 = vst.msk [vmem:[%s1531_s15 + $0x8] sm:$0xff] %vm559_vm8, %v565_v58 }
 0x242   : > { %v592_v59 = vpop.permute.xlu2 %591 }
 0x243   : > { %890 = vst.msk [vmem:[%s1539_s22 + $0x10] sm:$0xff] %vm559_vm8, %v592_v59 }
 0x24a   : > { %v571_v60 = vpop.permute.xlu1 %570  ;;  %v607_v61 = vpop.permute.xlu2 %606 }
 0x24b   : > { %886 = vst.msk [vmem:[%s1535_s19 + $0x8] sm:$0xff] %vm559_vm8, %v571_v60 }
 0x24c   : > { %893 = vst.msk [vmem:[%s1539_s22 + $0x18] sm:$0xff] %vm559_vm8, %v607_v61 }
 0x251   : > { %v577_v62 = vpop.permute.xlu0 %576 }
 0x252   : > { %887 = vst.msk [vmem:[%s1539_s22 + $0x8] sm:$0xff] %vm559_vm8, %v577_v62  ;;  %v587_v63 = vpop.permute.xlu1 %586 }
 0x253   : > { %889 = vst.msk [vmem:[%s1535_s19 + $0x10] sm:$0xff] %vm559_vm8, %v587_v63 }
 0x254   : > { %1214 = shalt.err (!%p1211_p13)
}
 0x255   : > { %s1349_s19 = smov 128   ;;  %s1350_s22 = smov 8  }
 0x256   : > { %927 = dma.vmem_to_hbm [thread:$0]  (%p1484_p0), %s1566_s25, 512, %s656_s14, %s1581_s11, %s1349_s19, %s1349_s19, %s1350_s22  }
 0x257   : > { %s1229_s18 = sshra.s32 %s674_s0, 4  ;;  %s1235_s1 = scalar_lea.hbm %s1673_s8, 64  ;;  %s1230_s18 = int_to_ptr.hbm [resolvable:$true] %s1229_s18 }
 0x258   : > { %s1231_s2 = scalar_lea.hbm %s1230_s18, 32  ;;  %p1236_p11 = scmp.lt.s32.totalorder %s1230_s18, %s1673_s8 }
 0x259   : > { %p1232_p2 = scmp.ne.s32.totalorder %s1230_s18, %s1231_s2  ;;  %p1237_p1 = scmp.lt.s32.totalorder %s1235_s1, %s1231_s2 }
 0x25b   : > { %p1233_p5 = pnand %p1232_p2, %p1484_p0  ;;  %p1238_p3 = por %p1237_p1, %p1236_p11 }
 0x25d   : > { %p1234_p7 = pneg %p1233_p5 }
 0x25f   : > { %p1239_p8 = pnand %p1238_p3, %p1234_p7 }
 0x261   : > { %1242 = shalt.err (!%p1239_p8)
}
 0x262   : > { %928 = dma.vmem_to_hbm [thread:$0]  (%p1484_p0), %s1574_s24, 512, %s674_s0, %s1581_s11, %s1349_s19, %s1349_s19, %s1350_s22   ;;  %v582_v0 = vpop.permute.xlu1 %581 }
 0x263   : > { %888 = vst.msk [vmem:[%s1531_s15 + $0x10] sm:$0xff] %vm559_vm8, %v582_v0  ;;  %s634_s30 = scalar_lea.hbm %s1671_s6, %s1550_s26  ;;  %s635_s18 = sshll.u32 %s1531_s15, 4  ;;  %s636_s18 = int_to_ptr.vmem [resolvable:$true] %s635_s18 }
 0x264   : > { %s637_s2 = sshll.u32 %s634_s30, 4  ;;  %s612_s20 = scalar_lea.sflag [#allocation4], %s1506_s23  ;;  %s638_s2 = int_to_ptr.hbm [resolvable:$true] %s637_s2 }
 0x265   : > { %s1257_s17 = sshra.s32 %s638_s2, 4  ;;  %s1263_s11 = scalar_lea.hbm %s1671_s6, 64  ;;  %s1258_s17 = int_to_ptr.hbm [resolvable:$true] %s1257_s17 }
 0x266   : > { %s1259_s1 = scalar_lea.hbm %s1258_s17, 32  ;;  %p1264_p13 = scmp.lt.s32.totalorder %s1258_s17, %s1671_s6 }
 0x267   : > { %p1260_p9 = scmp.ne.s32.totalorder %s1258_s17, %s1259_s1  ;;  %p1265_p2 = scmp.lt.s32.totalorder %s1263_s11, %s1259_s1 }
 0x269   : > { %p1261_p10 = pnand %p1260_p9, %p1484_p0  ;;  %p1266_p5 = por %p1265_p2, %p1264_p13 }
 0x26a   : > { %v597_v1 = vpop.permute.xlu1 %596 }
 0x26b   : > { %891 = vst.msk [vmem:[%s1531_s15 + $0x18] sm:$0xff] %vm559_vm8, %v597_v1  ;;  %p1262_p12 = pneg %p1261_p10 }
 0x26d   : > { %p1267_p7 = pnand %p1266_p5, %p1262_p12 }
 0x26f   : > { %1270 = shalt.err (!%p1267_p7)
}
 0x270   : > { %926 = dma.vmem_to_hbm [thread:$0]  (%p1484_p0), %s636_s18, 512, %s638_s2, %s612_s20, %s1349_s19, %s1349_s19, %s1350_s22  }
 0x271 PF: > { %s688_s23 = sand.u32 1, %s1317_s27   ;;  %p950_p11 = pnand %p870_p4, %p1493_p6 }
 0x272   : > { %s689_s15 = scalar_lea.sflag [#allocation4], %s688_s23 }
 0x273   : > { %p951_p1 = pneg %p950_p11 }
 0x275   : > { %1308 = dma.done.wait (%p951_p1), %s689_s15, 512  }
 0x276   : > { %1310 = vsyncadd (%p951_p1), %s689_s15, 4294966784  ;;  %s1690_s4 = sadd.s32 4294967294, %s1337_s10  }
 0x277   : > { %s698_s25 = sand.u32 1, %s1690_s4  }
 0x278   : > { %s699_s12 = scalar_lea.sflag [#allocation13], %s698_s25 }
 0x279   : > { %1312 = dma.done.wait (%p951_p1), %s699_s12, 1024  }
 0x27a   : > { %1314 = vsyncadd (%p951_p1), %s699_s12, 4294966272  ;;  %s30_s10 = sadd.s32 1, %s1337_s10   ;;  %s1691_s27 = smov %s1321_s28 }
 0x27b   : > { %p27_p0 = scmp.ge.s32.totalorder %s30_s10, 4   ;;  %s1692_s28 = smov %s1325_s29 }
 0x27c   : > { %s1693_s29 = smov %s1491_s13  ;;  %s1694_s30 = smov %s1333_s9 }
 0x27d   : > { %s1695_s9 = smov %s1697_s21  ;;  %29 = sbr.rel (!%p27_p0) target bundleno = 16 (0x10), region = 146 }
 0x282   :  { %715 = vsyncpa [#allocation3], 1 }
 0x283   :  { %717 = vsyncpa [#allocation3 + $0x1], 1 }
 0x284   :  { %718 = vsyncpa [#allocation6], 1 }
 0x285   :  { %719 = vsyncpa [#allocation9], 1 }
 0x286   :  { %720 = vsyncpa [#allocation4], 1 }
 0x287   :  { %722 = vsyncpa [#allocation4 + $0x1], 1 }
 0x288   :  { %723 = vsyncpa [#allocation13], 1 }
 0x289   :  { %725 = vsyncpa [#allocation13 + $0x1], 1 }

</bundles_post_ra>
